<compile_context>
chip_gen: v7x
topology: tpu7x:2x2x1
jax: 0.10.0
libtpu: 0.0.40
codegen_flags: <defaults>
</compile_context>

<pallas_src>
import functools

import jax
import jax.numpy as jnp
from jax.experimental import pallas as pl
from jax.experimental.pallas import tpu as pltpu

LANE = 128


def _round_up(v, m):
    return ((v + m - 1) // m) * m


def _pad2(x, rows, cols):
    return jnp.pad(x, ((0, rows - x.shape[0]), (0, cols - x.shape[1])))


def _clamp_vmem(nbytes):
    return int(min(max(2 * nbytes, 32 * 1024 * 1024), 60 * 1024 * 1024))


# ---------------------------------------------------------------------------
# Fused path: all 5 GCN layers in a single gridless kernel (small N).
# ---------------------------------------------------------------------------
def _vgae_fused_kernel(
    a_ref,                # [N, N]       bf16 normalized adjacency
    x_ref,                # [N, Cin_p]   bf16 node features (lane-padded)
    w1_ref, b1_ref,       # conv1:       Cin_p -> H_p
    w2_ref, b2_ref,       # conv2:       H_p   -> H_p
    w3_ref, b3_ref,       # conv3:       H_p   -> H_p
    wh_ref, bh_ref,       # fused head:  H_p   -> pad(2*O)  == [mu | logstd]
    out_ref,              # [N, pad(2*O)] f32
):
    a = a_ref[...]        # single VMEM-resident copy of A, reused by every layer

    def gcn(h_bf16, w_ref, b_ref, relu):
        # GCNConv: A_hat @ (h @ W) + b ; both matmuls on the MXU, f32 accumulation.
        hw = jnp.dot(h_bf16, w_ref[...], preferred_element_type=jnp.float32)
        y = jnp.dot(a, hw.astype(jnp.bfloat16),
                    preferred_element_type=jnp.float32) + b_ref[...]
        if relu:
            y = jnp.maximum(y, 0.0)
        return y  # f32

    h1 = gcn(x_ref[...], w1_ref, b1_ref, relu=True)               # dropout = identity (eval)
    h2 = gcn(h1.astype(jnp.bfloat16), w2_ref, b2_ref, relu=True)  # dropout = identity (eval)
    h3 = gcn(h2.astype(jnp.bfloat16), w3_ref, b3_ref, relu=True)  # dropout = identity (eval)
    # Fused heads: one A-sized matmul produces [mu | logstd].
    out_ref[...] = gcn(h3.astype(jnp.bfloat16), wh_ref, bh_ref,
                       relu=False).astype(out_ref.dtype)


# ---------------------------------------------------------------------------
# Tiled path: per layer, (1) small gridless feature transform HW = H @ W,
# (2) row-tiled aggregation out = A_hat @ HW + b (+ relu).
# ---------------------------------------------------------------------------
def _feature_transform_kernel(h_ref, w_ref, out_ref):
    out_ref[...] = jnp.dot(
        h_ref[...], w_ref[...], preferred_element_type=jnp.float32
    ).astype(out_ref.dtype)


def _aggregate_kernel(a_ref, hw_ref, b_ref, out_ref, *, relu):
    y = jnp.dot(a_ref[...], hw_ref[...],
                preferred_element_type=jnp.float32) + b_ref[...]
    if relu:
        y = jnp.maximum(y, 0.0)
    out_ref[...] = y.astype(out_ref.dtype)


def _gcn_layer_tiled(a_p, h, w, b, *, relu, row_tile, out_dtype):
    n_p = a_p.shape[0]
    cin = h.shape[1]
    cout = w.shape[1]

    vmem_spec = pl.BlockSpec(memory_space=pltpu.MemorySpace.VMEM)

    # (1) HW = H @ W, bf16 output feeding the MXU of the aggregation step.
    ft_bytes = n_p * cin * 2 + cin * cout * 2 + n_p * cout * 2
    hw = pl.pallas_call(
        _feature_transform_kernel,
        out_shape=jax.ShapeDtypeStruct((n_p, cout), jnp.bfloat16),
        in_specs=[vmem_spec, vmem_spec],
        out_specs=vmem_spec,
        compiler_params=pltpu.CompilerParams(
            vmem_limit_bytes=_clamp_vmem(ft_bytes)),
    )(h, w)

    # (2) row-tiled A_hat @ HW: no cross-step state -> fully parallel row axis.
    tm = row_tile
    grid = (n_p // tm,)
    agg_bytes = (
        2 * tm * n_p * 2            # A row tiles (bf16), double-buffered
        + n_p * cout * 2            # HW (bf16, resident)
        + 2 * 1 * cout * 4          # b (f32)
        + 2 * tm * cout * 4         # output tiles
    )
    return pl.pallas_call(
        functools.partial(_aggregate_kernel, relu=relu),
        out_shape=jax.ShapeDtypeStruct((n_p, cout), out_dtype),
        grid_spec=pltpu.PrefetchScalarGridSpec(
            num_scalar_prefetch=0,
            grid=grid,
            in_specs=[
                pl.BlockSpec((tm, n_p), lambda i: (i, 0)),     # A_hat row tile
                pl.BlockSpec((n_p, cout), lambda i: (0, 0)),   # HW (resident)
                pl.BlockSpec((1, cout), lambda i: (0, 0)),     # b
            ],
            out_specs=pl.BlockSpec((tm, cout), lambda i: (i, 0)),
        ),
        compiler_params=pltpu.CompilerParams(
            dimension_semantics=("parallel",),
            vmem_limit_bytes=_clamp_vmem(agg_bytes),
        ),
    )(a_p, hw, b)


# ---------------------------------------------------------------------------
# Wrapper: pad / fuse parameters, pick the fused or tiled path.
# ---------------------------------------------------------------------------
def vgae_encoder(a_hat, x, params, *, force_tiled=False, row_tile=128):
    """Returns (mu, logstd) of the 5-layer GCN encoder (dense A_hat precomputed)."""
    n, cin = x.shape
    hidden = params["w1"].shape[1]
    out_ch = params["w_mu"].shape[1]

    cin_p = _round_up(cin, LANE)
    hid_p = _round_up(hidden, LANE)
    head_p = _round_up(2 * out_ch, LANE)

    # Fuse the two heads: one [H, 2*O] weight -> a single A-sized matmul.
    w_head = jnp.concatenate([params["w_mu"], params["w_logstd"]], axis=1)
    b_head = jnp.concatenate([params["b_mu"], params["b_logstd"]], axis=1)

    # Lane-pad all channel dims to multiples of 128; MXU inputs in bf16.
    w1 = _pad2(params["w1"], cin_p, hid_p).astype(jnp.bfloat16)
    w2 = _pad2(params["w2"], hid_p, hid_p).astype(jnp.bfloat16)
    w3 = _pad2(params["w3"], hid_p, hid_p).astype(jnp.bfloat16)
    wh = _pad2(w_head, hid_p, head_p).astype(jnp.bfloat16)
    b1 = _pad2(params["b1"], 1, hid_p)
    b2 = _pad2(params["b2"], 1, hid_p)
    b3 = _pad2(params["b3"], 1, hid_p)
    bh = _pad2(b_head, 1, head_p)

    # Fused single-block path while bf16 A_hat comfortably fits VMEM (N=2048 -> 8 MiB),
    # otherwise stream A_hat in row tiles (scales past the 64 MiB v7x / 16 MiB v5e limits).
    use_tiled = force_tiled or n > 2048

    if not use_tiled:
        a_bf16 = a_hat.astype(jnp.bfloat16)
        x_p = _pad2(x, n, cin_p).astype(jnp.bfloat16)
        args = (a_bf16, x_p, w1, b1, w2, b2, w3, b3, wh, bh)

        vmem_bytes = (
            n * n * 2 + n * cin_p * 2
            + (cin_p * hid_p + 2 * hid_p * hid_p + hid_p * head_p) * 2
            + (3 * hid_p + head_p) * 4
            + n * head_p * 4
            + 4 * n * hid_p * 4          # headroom for live intermediates h1..h3
        )

        vmem_spec = pl.BlockSpec(memory_space=pltpu.MemorySpace.VMEM)
        out = pl.pallas_call(
            _vgae_fused_kernel,
            out_shape=jax.ShapeDtypeStruct((n, head_p), jnp.float32),
            in_specs=[vmem_spec] * len(args),
            out_specs=vmem_spec,
            compiler_params=pltpu.CompilerParams(
                vmem_limit_bytes=_clamp_vmem(vmem_bytes)),
        )(*args)
    else:
        n_p = _round_up(n, row_tile)
        a_p = _pad2(a_hat, n_p, n_p).astype(jnp.bfloat16)
        h = _pad2(x, n_p, cin_p).astype(jnp.bfloat16)
        h = _gcn_layer_tiled(a_p, h, w1, b1, relu=True, row_tile=row_tile,
                             out_dtype=jnp.bfloat16)
        h = _gcn_layer_tiled(a_p, h, w2, b2, relu=True, row_tile=row_tile,
                             out_dtype=jnp.bfloat16)
        h = _gcn_layer_tiled(a_p, h, w3, b3, relu=True, row_tile=row_tile,
                             out_dtype=jnp.bfloat16)
        out = _gcn_layer_tiled(a_p, h, wh, bh, relu=False, row_tile=row_tile,
                               out_dtype=jnp.float32)

    mu = out[:n, :out_ch]
    logstd = out[:n, out_ch:2 * out_ch]
    return mu, logstd


# ---------------------------------------------------------------------------
# Plain-JAX glue: graph construction, parameters, references.
# ---------------------------------------------------------------------------
def build_normalized_adjacency(edge_index, num_nodes):
    """Dense equivalent of PyG gcn_norm with self-loops: D^{-1/2}(A+I)D^{-1/2}."""
    src = edge_index[0]
    dst = edge_index[1]
    a = jnp.zeros((num_nodes, num_nodes), dtype=jnp.float32)
    a = a.at[dst, src].set(1.0)              # message flows src -> dst
    idx = jnp.arange(num_nodes)
    a = a.at[idx, idx].set(1.0)              # self loops
    deg = jnp.sum(a, axis=1)
    dinv = jnp.where(deg > 0, jax.lax.rsqrt(deg), 0.0)
    return dinv[:, None] * a * dinv[None, :]


def ring_edge_index(n):
    idx = jnp.arange(n)
    src = jnp.concatenate([idx, (idx + 1) % n])
    dst = jnp.concatenate([(idx + 1) % n, idx])
    return jnp.stack([src, dst], axis=0).astype(jnp.int32)


def init_params(key, in_channels, hidden_channels, out_channels):
    """Deterministic glorot-style weights and small random biases."""
    def glorot(k, fan_in, fan_out):
        limit = jnp.sqrt(6.0 / (fan_in + fan_out))
        return jax.random.uniform(k, (fan_in, fan_out), jnp.float32,
                                  minval=-limit, maxval=limit)

    ks = jax.random.split(key, 10)
    return {
        "w1": glorot(ks[0], in_channels, hidden_channels),
        "b1": 0.01 * jax.random.normal(ks[1], (1, hidden_channels), jnp.float32),
        "w2": glorot(ks[2], hidden_channels, hidden_channels),
        "b2": 0.01 * jax.random.normal(ks[3], (1, hidden_channels), jnp.float32),
        "w3": glorot(ks[4], hidden_channels, hidden_channels),
        "b3": 0.01 * jax.random.normal(ks[5], (1, hidden_channels), jnp.float32),
        "w_mu": glorot(ks[6], hidden_channels, out_channels),
        "b_mu": 0.01 * jax.random.normal(ks[7], (1, out_channels), jnp.float32),
        "w_logstd": glorot(ks[8], hidden_channels, out_channels),
        "b_logstd": 0.01 * jax.random.normal(ks[9], (1, out_channels), jnp.float32),
    }


def reference_mirrored(a_hat, x, params):
    """Pure-JAX reference mirroring the kernel's bf16-input / f32-accum scheme."""
    a = a_hat.astype(jnp.bfloat16)

    def gcn(h_bf16, w, b, relu):
        hw = jnp.dot(h_bf16, w.astype(jnp.bfloat16),
                     preferred_element_type=jnp.float32)
        y = jnp.dot(a, hw.astype(jnp.bfloat16),
                    preferred_element_type=jnp.float32) + b
        return jnp.maximum(y, 0.0) if relu else y

    h = x.astype(jnp.bfloat16)
    h = gcn(h, params["w1"], params["b1"], True).astype(jnp.bfloat16)
    h = gcn(h, params["w2"], params["b2"], True).astype(jnp.bfloat16)
    h = gcn(h, params["w3"], params["b3"], True).astype(jnp.bfloat16)
    mu = gcn(h, params["w_mu"], params["b_mu"], False)
    ls = gcn(h, params["w_logstd"], params["b_logstd"], False)
    return mu, ls


def reference_f32(a_hat, x, params):
    """Full-f32 reference (matches the PyTorch module's math at eval time)."""
    def gcn(h, w, b, relu):
        y = a_hat @ (h @ w) + b
        return jnp.maximum(y, 0.0) if relu else y

    h1 = gcn(x, params["w1"], params["b1"], True)
    h2 = gcn(h1, params["w2"], params["b2"], True)
    h3 = gcn(h2, params["w3"], params["b3"], True)
    return (gcn(h3, params["w_mu"], params["b_mu"], False),
            gcn(h3, params["w_logstd"], params["b_logstd"], False))


if __name__ == "__main__":
    IN_CHANNELS, HIDDEN_CHANNELS, OUT_CHANNELS = 8, 32, 16

    key = jax.random.PRNGKey(0)
    k_x1, k_x2, k_params = jax.random.split(key, 3)
    params = init_params(k_params, IN_CHANNELS, HIDDEN_CHANNELS, OUT_CHANNELS)

    def check(mu, ls, a_hat, x, n):
        mu = jax.block_until_ready(mu)
        ls = jax.block_until_ready(ls)
        assert mu.shape == (n, OUT_CHANNELS) and ls.shape == (n, OUT_CHANNELS)
        mu_m, ls_m = reference_mirrored(a_hat, x, params)
        mu_f, ls_f = reference_f32(a_hat, x, params)
        # Tight check vs a reference using the same bf16-in / f32-accum scheme.
        assert jnp.allclose(mu, mu_m, atol=1e-3, rtol=1e-3)
        assert jnp.allclose(ls, ls_m, atol=1e-3, rtol=1e-3)
        # Loose check vs the pure-f32 (PyTorch-equivalent) math.
        assert jnp.allclose(mu, mu_f, atol=5e-2, rtol=5e-2)
        assert jnp.allclose(ls, ls_f, atol=5e-2, rtol=5e-2)

    # Small graph (ring, 16 nodes) -> fused single-block kernel.
    N1 = 16
    a1 = build_normalized_adjacency(ring_edge_index(N1), N1)
    x1 = jax.random.normal(k_x1, (N1, IN_CHANNELS), jnp.float32)
    mu1, ls1 = vgae_encoder(a1, x1, params)
    check(mu1, ls1, a1, x1, N1)

    # Larger graph (ring, 256 nodes) -> row-tiled per-layer kernels (streams A_hat).
    N2 = 256
    a2 = build_normalized_adjacency(ring_edge_index(N2), N2)
    x2 = jax.random.normal(k_x2, (N2, IN_CHANNELS), jnp.float32)
    mu2, ls2 = vgae_encoder(a2, x2, params, force_tiled=True)
    check(mu2, ls2, a2, x2, N2)

    print("KERNEL_OK")
</pallas_src>

<mosaic_0001>
module attributes {stable_mosaic.version = 11 : i64} {
  func.func @_vgae_fused_kernel(%arg0: memref<16x16xbf16, #tpu.memory_space<vmem>>, %arg1: memref<16x128xbf16, #tpu.memory_space<vmem>>, %arg2: memref<128x128xbf16, #tpu.memory_space<vmem>>, %arg3: memref<1x128xf32, #tpu.memory_space<vmem>>, %arg4: memref<128x128xbf16, #tpu.memory_space<vmem>>, %arg5: memref<1x128xf32, #tpu.memory_space<vmem>>, %arg6: memref<128x128xbf16, #tpu.memory_space<vmem>>, %arg7: memref<1x128xf32, #tpu.memory_space<vmem>>, %arg8: memref<128x128xbf16, #tpu.memory_space<vmem>>, %arg9: memref<1x128xf32, #tpu.memory_space<vmem>>, %arg10: memref<16x128xf32, #tpu.memory_space<vmem>>) attributes {dimension_semantics = [], scalar_prefetch = 0 : i64, scratch_operands = 0 : i64, tpu.core_type = #tpu.core_type<tc>} {
    %c0 = arith.constant 0 : index
    %c0_0 = arith.constant 0 : index
    %0 = vector.load %arg0[%c0, %c0_0] : memref<16x16xbf16, #tpu.memory_space<vmem>>, vector<16x16xbf16>
    %c0_1 = arith.constant 0 : index
    %c0_2 = arith.constant 0 : index
    %1 = vector.load %arg1[%c0_1, %c0_2] : memref<16x128xbf16, #tpu.memory_space<vmem>>, vector<16x128xbf16>
    %c0_3 = arith.constant 0 : index
    %c0_4 = arith.constant 0 : index
    %2 = vector.load %arg2[%c0_3, %c0_4] : memref<128x128xbf16, #tpu.memory_space<vmem>>, vector<128x128xbf16>
    %cst = arith.constant dense<0.000000e+00> : vector<16x128xf32>
    %3 = tpu.matmul %1, %2, %cst {dimension_numbers = #tpu.dot_dimension_numbers<[1], [0], [0], [1], [0, 0, 1, 1], [], []>} : vector<16x128xbf16>, vector<128x128xbf16>, vector<16x128xf32> -> vector<16x128xf32>
    %4 = arith.truncf %3 : vector<16x128xf32> to vector<16x128xbf16>
    %cst_5 = arith.constant dense<0.000000e+00> : vector<16x128xf32>
    %5 = tpu.matmul %0, %4, %cst_5 {dimension_numbers = #tpu.dot_dimension_numbers<[1], [0], [0], [1], [0, 0, 1, 1], [], []>} : vector<16x16xbf16>, vector<16x128xbf16>, vector<16x128xf32> -> vector<16x128xf32>
    %c0_6 = arith.constant 0 : index
    %c0_7 = arith.constant 0 : index
    %6 = vector.load %arg3[%c0_6, %c0_7] : memref<1x128xf32, #tpu.memory_space<vmem>>, vector<1x128xf32>
    %7 = vector.broadcast %6 : vector<1x128xf32> to vector<16x128xf32>
    %8 = arith.addf %5, %7 : vector<16x128xf32>
    %cst_8 = arith.constant 0.000000e+00 : f32
    %9 = vector.broadcast %cst_8 : f32 to vector<16x128xf32>
    %10 = arith.maximumf %8, %9 : vector<16x128xf32>
    %11 = arith.truncf %10 : vector<16x128xf32> to vector<16x128xbf16>
    %c0_9 = arith.constant 0 : index
    %c0_10 = arith.constant 0 : index
    %12 = vector.load %arg4[%c0_9, %c0_10] : memref<128x128xbf16, #tpu.memory_space<vmem>>, vector<128x128xbf16>
    %cst_11 = arith.constant dense<0.000000e+00> : vector<16x128xf32>
    %13 = tpu.matmul %11, %12, %cst_11 {dimension_numbers = #tpu.dot_dimension_numbers<[1], [0], [0], [1], [0, 0, 1, 1], [], []>} : vector<16x128xbf16>, vector<128x128xbf16>, vector<16x128xf32> -> vector<16x128xf32>
    %14 = arith.truncf %13 : vector<16x128xf32> to vector<16x128xbf16>
    %cst_12 = arith.constant dense<0.000000e+00> : vector<16x128xf32>
    %15 = tpu.matmul %0, %14, %cst_12 {dimension_numbers = #tpu.dot_dimension_numbers<[1], [0], [0], [1], [0, 0, 1, 1], [], []>} : vector<16x16xbf16>, vector<16x128xbf16>, vector<16x128xf32> -> vector<16x128xf32>
    %c0_13 = arith.constant 0 : index
    %c0_14 = arith.constant 0 : index
    %16 = vector.load %arg5[%c0_13, %c0_14] : memref<1x128xf32, #tpu.memory_space<vmem>>, vector<1x128xf32>
    %17 = vector.broadcast %16 : vector<1x128xf32> to vector<16x128xf32>
    %18 = arith.addf %15, %17 : vector<16x128xf32>
    %cst_15 = arith.constant 0.000000e+00 : f32
    %19 = vector.broadcast %cst_15 : f32 to vector<16x128xf32>
    %20 = arith.maximumf %18, %19 : vector<16x128xf32>
    %21 = arith.truncf %20 : vector<16x128xf32> to vector<16x128xbf16>
    %c0_16 = arith.constant 0 : index
    %c0_17 = arith.constant 0 : index
    %22 = vector.load %arg6[%c0_16, %c0_17] : memref<128x128xbf16, #tpu.memory_space<vmem>>, vector<128x128xbf16>
    %cst_18 = arith.constant dense<0.000000e+00> : vector<16x128xf32>
    %23 = tpu.matmul %21, %22, %cst_18 {dimension_numbers = #tpu.dot_dimension_numbers<[1], [0], [0], [1], [0, 0, 1, 1], [], []>} : vector<16x128xbf16>, vector<128x128xbf16>, vector<16x128xf32> -> vector<16x128xf32>
    %24 = arith.truncf %23 : vector<16x128xf32> to vector<16x128xbf16>
    %cst_19 = arith.constant dense<0.000000e+00> : vector<16x128xf32>
    %25 = tpu.matmul %0, %24, %cst_19 {dimension_numbers = #tpu.dot_dimension_numbers<[1], [0], [0], [1], [0, 0, 1, 1], [], []>} : vector<16x16xbf16>, vector<16x128xbf16>, vector<16x128xf32> -> vector<16x128xf32>
    %c0_20 = arith.constant 0 : index
    %c0_21 = arith.constant 0 : index
    %26 = vector.load %arg7[%c0_20, %c0_21] : memref<1x128xf32, #tpu.memory_space<vmem>>, vector<1x128xf32>
    %27 = vector.broadcast %26 : vector<1x128xf32> to vector<16x128xf32>
    %28 = arith.addf %25, %27 : vector<16x128xf32>
    %cst_22 = arith.constant 0.000000e+00 : f32
    %29 = vector.broadcast %cst_22 : f32 to vector<16x128xf32>
    %30 = arith.maximumf %28, %29 : vector<16x128xf32>
    %31 = arith.truncf %30 : vector<16x128xf32> to vector<16x128xbf16>
    %c0_23 = arith.constant 0 : index
    %c0_24 = arith.constant 0 : index
    %32 = vector.load %arg8[%c0_23, %c0_24] : memref<128x128xbf16, #tpu.memory_space<vmem>>, vector<128x128xbf16>
    %cst_25 = arith.constant dense<0.000000e+00> : vector<16x128xf32>
    %33 = tpu.matmul %31, %32, %cst_25 {dimension_numbers = #tpu.dot_dimension_numbers<[1], [0], [0], [1], [0, 0, 1, 1], [], []>} : vector<16x128xbf16>, vector<128x128xbf16>, vector<16x128xf32> -> vector<16x128xf32>
    %34 = arith.truncf %33 : vector<16x128xf32> to vector<16x128xbf16>
    %cst_26 = arith.constant dense<0.000000e+00> : vector<16x128xf32>
    %35 = tpu.matmul %0, %34, %cst_26 {dimension_numbers = #tpu.dot_dimension_numbers<[1], [0], [0], [1], [0, 0, 1, 1], [], []>} : vector<16x16xbf16>, vector<16x128xbf16>, vector<16x128xf32> -> vector<16x128xf32>
    %c0_27 = arith.constant 0 : index
    %c0_28 = arith.constant 0 : index
    %36 = vector.load %arg9[%c0_27, %c0_28] : memref<1x128xf32, #tpu.memory_space<vmem>>, vector<1x128xf32>
    %37 = vector.broadcast %36 : vector<1x128xf32> to vector<16x128xf32>
    %38 = arith.addf %35, %37 : vector<16x128xf32>
    %c0_29 = arith.constant 0 : index
    %c0_30 = arith.constant 0 : index
    %39 = vector.load %arg10[%c0_29, %c0_30] : memref<16x128xf32, #tpu.memory_space<vmem>>, vector<16x128xf32>
    tpu.vector_store %arg10[%c0_29, %c0_30], %38 {strides = array<i32>} : memref<16x128xf32, #tpu.memory_space<vmem>>, vector<16x128xf32>,
    return
  }
}

</mosaic_0001>

<bundles_post_ra>
// kernel: tpu_custom_call.1
= control target key start
LH: loop header
LB: loop body
LE: loop exit
PB: predicated region body
PF: predicated region fallthrough
CT: control target
= control target key end

     0   :  { %15 = vsyncpa [#allocation3], 0  ;;  %s1451_s0 = inlined_call_operand.hbm [shape: bf16[16,16], index: 0, kind: input, shape index: {}]   ;;  %s1452_s1 = inlined_call_operand.hbm [shape: bf16[16,128], index: 1, kind: input, shape index: {}]   ;;  %s1453_s2 = inlined_call_operand.hbm [shape: bf16[128,128], index: 2, kind: input, shape index: {}]   ;;  %s1454_s3 = inlined_call_operand.vmem [shape: f32[1,128], index: 3, kind: input, shape index: {}]   ;;  %s1455_s4 = inlined_call_operand.hbm [shape: bf16[128,128], index: 4, kind: input, shape index: {}]   ;;  %s1456_s5 = inlined_call_operand.vmem [shape: f32[1,128], index: 5, kind: input, shape index: {}]   ;;  %s1457_s6 = inlined_call_operand.hbm [shape: bf16[128,128], index: 6, kind: input, shape index: {}]   ;;  %s1458_s7 = inlined_call_operand.vmem [shape: f32[1,128], index: 7, kind: input, shape index: {}]   ;;  %s1459_s8 = inlined_call_operand.hbm [shape: bf16[128,128], index: 8, kind: input, shape index: {}]   ;;  %s1460_s9 = inlined_call_operand.vmem [shape: f32[1,128], index: 9, kind: input, shape index: {}]   ;;  %s1461_s10 = inlined_call_operand.hbm [shape: f32[16,128], index: 10, kind: output, shape index: {}]  }
   0x1   :  { %16 = vsyncpa [#allocation6], 0 }
   0x2   :  { %17 = vsyncpa [#allocation9], 0 }
   0x3   :  { %18 = vsyncpa [#allocation12], 0 }
   0x4   :  { %19 = vsyncpa [#allocation4], 0  ;;  %s1186_s13 = smov [#allocation5]   ;;  %s1187_s15 = smov [#allocation8]  }
   0x5   :  { %s37_s14 = sshll.u32 %s1186_s13, 4  ;;  %s63_s16 = sshll.u32 %s1187_s15, 4  ;;  %s38_s14 = int_to_ptr.vmem [resolvable:$true] %s37_s14  ;;  %s1254_s16 = int_to_ptr.vmem [resolvable:$true] %s63_s16 }
   0x6   :  { %s1022_s19 = scalar_lea.hbm %s1452_s1, 128 }
   0x7   :  { %p1023_p0 = scmp.ne.s32.totalorder %s1452_s1, %s1022_s19  ;;  %p1026_p1 = scmp.lt.u32.totalorder %s1022_s19, %s1452_s1 }
   0x9   :  { %p1028_p2 = pnand %p1026_p1, %p1023_p0 }
   0xb   :  { %1031 = shalt.err (!%p1028_p2)
}
   0xc   :  { %s1032_s24 = scalar_lea.vmem %s38_s14, 128  ;;  %p1037_p4 = scmp.lt.s32.totalorder %s38_s14, %s38_s14 }
   0xd   :  { %p1033_p3 = scmp.ne.s32.totalorder %s38_s14, %s1032_s24  ;;  %p1038_p5 = scmp.lt.s32.totalorder %s1032_s24, %s1032_s24 }
   0xf   :  { %p1039_p6 = por %p1038_p5, %p1037_p4 }
  0x11   :  { %p1040_p7 = pnand %p1039_p6, %p1033_p3 }
  0x13   :  { %1043 = shalt.err (!%p1040_p7)
}
  0x14   :  { %s1188_s25 = smov 64   ;;  %s1189_s26 = smov 4  }
  0x15   :  { %43 = dma.hbm_to_vmem [thread:$0]  %s1452_s1, 128, %s38_s14, [#allocation6], %s1188_s25, %s1188_s25, %s1189_s26  }
  0x16   :  { %s1044_s11 = scalar_lea.hbm %s1455_s4, 1024 }
  0x17   :  { %p1045_p8 = scmp.ne.s32.totalorder %s1455_s4, %s1044_s11  ;;  %p1048_p9 = scmp.lt.u32.totalorder %s1044_s11, %s1455_s4 }
  0x19   :  { %p1050_p10 = pnand %p1048_p9, %p1045_p8 }
  0x1b   :  { %1053 = shalt.err (!%p1050_p10)
}
  0x1c   :  { %s1054_s18 = scalar_lea.vmem %s1254_s16, 1024  ;;  %p1059_p12 = scmp.lt.s32.totalorder %s1254_s16, %s1254_s16 }
  0x1d   :  { %p1055_p11 = scmp.ne.s32.totalorder %s1254_s16, %s1054_s18  ;;  %p1060_p13 = scmp.lt.s32.totalorder %s1054_s18, %s1054_s18 }
  0x1f   :  { %p1061_p0 = por %p1060_p13, %p1059_p12 }
  0x21   :  { %p1062_p1 = pnand %p1061_p0, %p1055_p11 }
  0x23   :  { %1065 = shalt.err (!%p1062_p1)
}
  0x24   :  { %69 = dma.hbm_to_vmem [thread:$0]  %s1455_s4, 1024, %s1254_s16, [#allocation9], %s1188_s25, %s1188_s25, %s1189_s26  }
  0x25   :  { %s1190_s19 = smov [#allocation2]   ;;  %s1191_s21 = smov [#allocation7]  }
  0x26   :  { %s25_s20 = sshll.u32 %s1190_s19, 4  ;;  %s49_s22 = sshll.u32 %s1191_s21, 4  ;;  %s26_s20 = int_to_ptr.vmem [resolvable:$true] %s25_s20  ;;  %s1291_s22 = int_to_ptr.vmem [resolvable:$true] %s49_s22 }
  0x27   :  { %s1066_s27 = scalar_lea.hbm %s1451_s0, 128 }
  0x28   :  { %p1067_p2 = scmp.ne.s32.totalorder %s1451_s0, %s1066_s27  ;;  %p1070_p3 = scmp.lt.u32.totalorder %s1066_s27, %s1451_s0 }
  0x2a   :  { %p1072_p4 = pnand %p1070_p3, %p1067_p2 }
  0x2c   :  { %1075 = shalt.err (!%p1072_p4)
}
  0x2d   :  { %s1076_s4 = scalar_lea.vmem %s26_s20, 128  ;;  %p1081_p6 = scmp.lt.s32.totalorder %s26_s20, %s26_s20 }
  0x2e   :  { %p1077_p5 = scmp.ne.s32.totalorder %s26_s20, %s1076_s4  ;;  %p1082_p7 = scmp.lt.s32.totalorder %s1076_s4, %s1076_s4 }
  0x30   :  { %p1083_p8 = por %p1082_p7, %p1081_p6 }
  0x32   :  { %p1084_p9 = pnand %p1083_p8, %p1077_p5 }
  0x34   :  { %1087 = shalt.err (!%p1084_p9)
}
  0x35   :  { %31 = dma.hbm_to_vmem [thread:$0]  %s1451_s0, 128, %s26_s20, [#allocation3], %s1188_s25, %s1188_s25, %s1189_s26  }
  0x36   :  { %s1088_s17 = scalar_lea.hbm %s1453_s2, 1024 }
  0x37   :  { %p1089_p10 = scmp.ne.s32.totalorder %s1453_s2, %s1088_s17  ;;  %p1092_p11 = scmp.lt.u32.totalorder %s1088_s17, %s1453_s2 }
  0x39   :  { %p1094_p12 = pnand %p1092_p11, %p1089_p10 }
  0x3b   :  { %1097 = shalt.err (!%p1094_p12)
}
  0x3c   :  { %s1098_s21 = scalar_lea.vmem %s1291_s22, 1024  ;;  %p1103_p0 = scmp.lt.s32.totalorder %s1291_s22, %s1291_s22 }
  0x3d   :  { %p1099_p13 = scmp.ne.s32.totalorder %s1291_s22, %s1098_s21  ;;  %p1104_p1 = scmp.lt.s32.totalorder %s1098_s21, %s1098_s21 }
  0x3f   :  { %p1105_p2 = por %p1104_p1, %p1103_p0 }
  0x41   :  { %p1106_p3 = pnand %p1105_p2, %p1099_p13 }
  0x43   :  { %1109 = shalt.err (!%p1106_p3)
}
  0x44   :  { %55 = dma.hbm_to_vmem [thread:$0]  %s1453_s2, 1024, %s1291_s22, [#allocation6], %s1188_s25, %s1188_s25, %s1189_s26  }
  0x45   :  { %s1192_s23 = smov [#allocation10]   ;;  %s1193_s27 = smov [#allocation11]  }
  0x46   :  { %s77_s24 = sshll.u32 %s1192_s23, 4  ;;  %s91_s28 = sshll.u32 %s1193_s27, 4  ;;  %s78_s24 = int_to_ptr.vmem [resolvable:$true] %s77_s24  ;;  %s1328_s28 = int_to_ptr.vmem [resolvable:$true] %s91_s28 }
  0x47   :  { %s1110_s11 = scalar_lea.hbm %s1457_s6, 1024 }
  0x48   :  { %p1111_p4 = scmp.ne.s32.totalorder %s1457_s6, %s1110_s11  ;;  %p1114_p5 = scmp.lt.u32.totalorder %s1110_s11, %s1457_s6 }
  0x4a   :  { %p1116_p6 = pnand %p1114_p5, %p1111_p4 }
  0x4c   :  { %1119 = shalt.err (!%p1116_p6)
}
  0x4d   :  { %s1120_s2 = scalar_lea.vmem %s78_s24, 1024  ;;  %p1125_p8 = scmp.lt.s32.totalorder %s78_s24, %s78_s24 }
  0x4e   :  { %p1121_p7 = scmp.ne.s32.totalorder %s78_s24, %s1120_s2  ;;  %p1126_p9 = scmp.lt.s32.totalorder %s1120_s2, %s1120_s2 }
  0x50   :  { %p1127_p10 = por %p1126_p9, %p1125_p8 }
  0x52   :  { %p1128_p11 = pnand %p1127_p10, %p1121_p7 }
  0x54   :  { %1131 = shalt.err (!%p1128_p11)
}
  0x55   :  { %83 = dma.hbm_to_vmem [thread:$0]  %s1457_s6, 1024, %s78_s24, [#allocation9], %s1188_s25, %s1188_s25, %s1189_s26  }
  0x56   :  { %s1132_s1 = scalar_lea.hbm %s1459_s8, 1024 }
  0x57   :  { %p1133_p12 = scmp.ne.s32.totalorder %s1459_s8, %s1132_s1  ;;  %p1136_p13 = scmp.lt.u32.totalorder %s1132_s1, %s1459_s8 }
  0x59   :  { %p1138_p0 = pnand %p1136_p13, %p1133_p12 }
  0x5b   :  { %1141 = shalt.err (!%p1138_p0)
}
  0x5c   :  { %s1142_s20 = scalar_lea.vmem %s1328_s28, 1024  ;;  %p1147_p2 = scmp.lt.s32.totalorder %s1328_s28, %s1328_s28 }
  0x5d   :  { %p1143_p1 = scmp.ne.s32.totalorder %s1328_s28, %s1142_s20  ;;  %p1148_p3 = scmp.lt.s32.totalorder %s1142_s20, %s1142_s20 }
  0x5f   :  { %p1149_p4 = por %p1148_p3, %p1147_p2 }
  0x61   :  { %p1150_p5 = pnand %p1149_p4, %p1143_p1 }
  0x63   :  { %1153 = shalt.err (!%p1150_p5)
}
  0x64   :  { %97 = dma.hbm_to_vmem [thread:$0]  %s1459_s8, 1024, %s1328_s28, [#allocation12], %s1188_s25, %s1188_s25, %s1189_s26  }
  0x65   :  { %1176 = dma.done.wait [#allocation3], 128  }
  0x66   :  { %1177 = vsyncadd [#allocation3], 4294967168 }
  0x67   :  { %1178 = dma.done.wait [#allocation6], 1152  }
  0x68   :  { %1179 = vsyncadd [#allocation6], 4294966144 }
  0x69   :  { %1180 = dma.done.wait [#allocation9], 2048  }
  0x6a   :  { %1181 = vsyncadd [#allocation9], 4294965248 }
  0x6b   :  { %1182 = dma.done.wait [#allocation12], 1024  }
  0x6c   :  { %1183 = vsyncadd [#allocation12], 4294966272  ;;  %v1194_v0 = vmov 0.0   ;;  %vm1195_vm0 = vmmov 0   ;;  %v988_v1 = vld [vmem:[#allocation7] sm:$0xff]   ;;  %v989_v2 = vld [vmem:[#allocation7 + $0x8] sm:$0xff]  }
  0x6d   :  { %871 = vmatprep.subr.bf16.mxu0 %v1194_v0  ;;  %887 = vmatprep.mubr.msk.bf16.mxu0 %vm1195_vm0, %v1194_v0  ;;  %v990_v3 = vld [vmem:[#allocation7 + $0x10] sm:$0xff]   ;;  %v991_v4 = vld [vmem:[#allocation7 + $0x18] sm:$0xff]   ;;  %v992_v5 = vld [vmem:[#allocation7 + $0x20] sm:$0xff]   ;;  %vm247_vm1 = vcmask 130048   ;;  %s1196_s28 = smov [#allocation13]  }
  0x6e   :  { %891 = vmatprep.subr.bf16.mxu1 %v1194_v0  ;;  %893 = vmatprep.mubr.msk.bf16.mxu1 %vm1195_vm0, %v1194_v0  ;;  %v993_v6 = vld [vmem:[#allocation7 + $0x28] sm:$0xff]   ;;  %v994_v7 = vld [vmem:[#allocation7 + $0x30] sm:$0xff]   ;;  %v995_v8 = vld [vmem:[#allocation7 + $0x38] sm:$0xff]   ;;  %s770_s29 = sshll.u32 %s1196_s28, 4  ;;  %s771_s29 = int_to_ptr.vmem [resolvable:$true] %s770_s29 }
  0x6f   :  { %872 = vmatpush3.bf16.msra.mxu0 %v988_v1  ;;  %v996_v9 = vld [vmem:[#allocation5] sm:$0xff]   ;;  %v1381_v15 = vld [vmem:[#allocation2] sm:$0xff]   ;;  %v998_v16 = vld [vmem:[#allocation8] sm:$0xff]   ;;  %s1154_s30 = scalar_lea.vmem %s771_s29, 256  ;;  %p1159_p7 = scmp.lt.s32.totalorder %s771_s29, %s771_s29 }
  0x70   :  { %873 = vmatprep.subr.bf16.mxu0 %v1194_v0  ;;  %v999_v17 = vld [vmem:[#allocation8 + $0x8] sm:$0xff]   ;;  %v1000_v18 = vld [vmem:[#allocation8 + $0x10] sm:$0xff]   ;;  %v1001_v19 = vld [vmem:[#allocation8 + $0x18] sm:$0xff]   ;;  %p1155_p6 = scmp.ne.s32.totalorder %s771_s29, %s1154_s30  ;;  %p1160_p8 = scmp.lt.s32.totalorder %s1154_s30, %s1154_s30 }
  0x71   :  { %v1002_v20 = vld [vmem:[#allocation8 + $0x20] sm:$0xff]   ;;  %v1003_v21 = vld [vmem:[#allocation8 + $0x28] sm:$0xff]   ;;  %v1004_v22 = vld [vmem:[#allocation8 + $0x30] sm:$0xff]  }
  0x72   :  { %v1005_v23 = vld [vmem:[#allocation8 + $0x38] sm:$0xff]   ;;  %v794_v24 = vld [vmem:[%s1454_s3] ss:$0 sm:$0xff]  ;;  %v1006_v34 = vld [vmem:[#allocation10] sm:$0xff]   ;;  %p1161_p9 = por %p1160_p8, %p1159_p7 }
  0x73   :  { %874 = vmatpush3.bf16.msra.mxu0 %v989_v2  ;;  %v1007_v35 = vld [vmem:[#allocation10 + $0x8] sm:$0xff]   ;;  %v1008_v36 = vld [vmem:[#allocation10 + $0x10] sm:$0xff]   ;;  %v1009_v37 = vld [vmem:[#allocation10 + $0x18] sm:$0xff]  }
  0x74   :  { %875 = vmatprep.subr.bf16.mxu0 %v1194_v0  ;;  %v1010_v38 = vld [vmem:[#allocation10 + $0x20] sm:$0xff]   ;;  %v1011_v39 = vld [vmem:[#allocation10 + $0x28] sm:$0xff]   ;;  %v1012_v45 = vld [vmem:[#allocation10 + $0x30] sm:$0xff]   ;;  %p1162_p10 = pnand %p1161_p9, %p1155_p6 }
  0x75   :  { %v1013_v46 = vld [vmem:[#allocation10 + $0x38] sm:$0xff]   ;;  %v805_v47 = vld [vmem:[%s1456_s5] ss:$0 sm:$0xff]  ;;  %v1014_v62 = vld [vmem:[#allocation11] sm:$0xff]  }
  0x76   :  { %v1015_v63 = vld [vmem:[#allocation11 + $0x8] sm:$0xff]   ;;  %v1016_v1 = vld [vmem:[#allocation11 + $0x10] sm:$0xff]   ;;  %v1017_v2 = vld [vmem:[#allocation11 + $0x18] sm:$0xff]  }
  0x77   :  { %876 = vmatpush3.bf16.msra.mxu0 %v990_v3  ;;  %v1018_v3 = vld [vmem:[#allocation11 + $0x20] sm:$0xff]  }
  0x78   :  { %877 = vmatprep.subr.bf16.mxu0 %v1194_v0 }
  0x7b   :  { %878 = vmatpush3.bf16.msra.mxu0 %v991_v4  ;;  %v1019_v4 = vld [vmem:[#allocation11 + $0x28] sm:$0xff]  }
  0x7c   :  { %879 = vmatprep.subr.bf16.mxu0 %v1194_v0 }
  0x7f   :  { %880 = vmatpush3.bf16.msra.mxu0 %v992_v5  ;;  %v1020_v5 = vld [vmem:[#allocation11 + $0x30] sm:$0xff]  }
  0x80   :  { %881 = vmatprep.subr.bf16.mxu0 %v1194_v0 }
  0x83   :  { %882 = vmatpush3.bf16.msra.mxu0 %v993_v6  ;;  %v1021_v6 = vld [vmem:[#allocation11 + $0x38] sm:$0xff]  }
  0x84   :  { %883 = vmatprep.subr.bf16.mxu0 %v1194_v0 }
  0x87   :  { %884 = vmatpush3.bf16.msra.mxu0 %v994_v7  ;;  %v815_v7 = vld [vmem:[%s1458_s7] ss:$0 sm:$0xff] }
  0x88   :  { %885 = vmatprep.subr.bf16.mxu0 %v1194_v0 }
  0x8b   :  { %886 = vmatpush3.bf16.msra.mxu0 %v995_v8 }
  0x8c   :  { %917 = vmatprep.subr.bf16.mxu0 %v1194_v0 }
  0x8e   :  { %888 = vmatmul.mubr.bf16.vlgmr.msra.gmra.mrb[0].mxu0 %v996_v9 }
  0x8f   :  { %919 = vmatprep.mubr.msk.bf16.mxu0 %vm1195_vm0, %v1194_v0 }
 0x161   :  { %v227_v10 = vpop.f32.mrb[0].mxu0 }
 0x162   :  { %v889_v11 = vpop.f32.mrb[1].mxu0 }
 0x163   :  { %v230_v12 = vpop.f32.mrb[2].mxu0 }
 0x164   :  { %v234_v13 = vpack.c.bf16 %v230_v12, %v227_v10  ;;  %v890_v14 = vpop.f32.mrb[3].mxu0 }
 0x166   :  { %892 = vmatpush3.bf16.msra.mxu1 %v234_v13 }
 0x167   :  { %897 = vmatprep.subr.bf16.mxu1 %v1194_v0 }
 0x169   :  { %894 = vmatmul.mubr.msk.bf16.vlgmr.msra.gmra.mrb[0].mxu1 %vm247_vm1, %v1381_v15 }
 0x16a   :  { %898 = vmatpush3.bf16.msra.mxu1 %v998_v16  ;;  %913 = vmatprep.mubr.msk.bf16.mxu1 %vm1195_vm0, %v1194_v0 }
 0x16b   :  { %899 = vmatprep.subr.bf16.mxu1 %v1194_v0 }
 0x16e   :  { %900 = vmatpush3.bf16.msra.mxu1 %v999_v17 }
 0x16f   :  { %901 = vmatprep.subr.bf16.mxu1 %v1194_v0 }
 0x172   :  { %902 = vmatpush3.bf16.msra.mxu1 %v1000_v18 }
 0x173   :  { %903 = vmatprep.subr.bf16.mxu1 %v1194_v0 }
 0x176   :  { %904 = vmatpush3.bf16.msra.mxu1 %v1001_v19 }
 0x177   :  { %905 = vmatprep.subr.bf16.mxu1 %v1194_v0 }
 0x17a   :  { %906 = vmatpush3.bf16.msra.mxu1 %v1002_v20 }
 0x17b   :  { %907 = vmatprep.subr.bf16.mxu1 %v1194_v0 }
 0x17e   :  { %908 = vmatpush3.bf16.msra.mxu1 %v1003_v21 }
 0x17f   :  { %909 = vmatprep.subr.bf16.mxu1 %v1194_v0 }
 0x182   :  { %910 = vmatpush3.bf16.msra.mxu1 %v1004_v22  ;;  %v825_v22 = vld [vmem:[%s1460_s9] ss:$0 sm:$0xff] }
 0x183   :  { %911 = vmatprep.subr.bf16.mxu1 %v1194_v0 }
 0x186   :  { %912 = vmatpush3.bf16.msra.mxu1 %v1005_v23 }
 0x187   :  { %923 = vmatprep.subr.bf16.mxu1 %v1194_v0 }
 0x23c   :  { %v285_v25 = vpop.f32.mrb[0].mxu1 }
 0x23d   :  { %v286_v26 = vadd.f32 %v794_v24, %v285_v25  ;;  %v895_v27 = vpop.f32.mrb[1].mxu1 }
 0x23e   :  { %v288_v28 = vpop.f32.mrb[2].mxu1 }
 0x23f   :  { %v289_v29 = vadd.f32 %v794_v24, %v288_v28  ;;  %v896_v30 = vpop.f32.mrb[3].mxu1  ;;  %v292_v31 = vmax.f32 %v286_v26, 0.0 }
 0x241   :  { %v293_v32 = vmax.f32 %v289_v29, 0.0 }
 0x243   :  { %v294_v33 = vpack.c.bf16 %v293_v32, %v292_v31 }
 0x245   :  { %914 = vmatmul.mubr.bf16.vlgmr.msra.gmra.mrb[4].mxu1 %v294_v33 }
 0x246   :  { %939 = vmatprep.mubr.msk.bf16.mxu1 %vm1195_vm0, %v1194_v0  ;;  %924 = vmatpush3.bf16.msra.mxu1 %v1006_v34 }
 0x247   :  { %925 = vmatprep.subr.bf16.mxu1 %v1194_v0 }
 0x24a   :  { %926 = vmatpush3.bf16.msra.mxu1 %v1007_v35 }
 0x24b   :  { %927 = vmatprep.subr.bf16.mxu1 %v1194_v0 }
 0x24e   :  { %928 = vmatpush3.bf16.msra.mxu1 %v1008_v36 }
 0x24f   :  { %929 = vmatprep.subr.bf16.mxu1 %v1194_v0 }
 0x252   :  { %930 = vmatpush3.bf16.msra.mxu1 %v1009_v37 }
 0x253   :  { %931 = vmatprep.subr.bf16.mxu1 %v1194_v0 }
 0x256   :  { %932 = vmatpush3.bf16.msra.mxu1 %v1010_v38 }
 0x257   :  { %933 = vmatprep.subr.bf16.mxu1 %v1194_v0 }
 0x25a   :  { %934 = vmatpush3.bf16.msra.mxu1 %v1011_v39 }
 0x25b   :  { %935 = vmatprep.subr.bf16.mxu1 %v1194_v0 }
 0x25e   :  { %936 = vmatpush3.bf16.msra.mxu1 %v1012_v45 }
 0x25f   :  { %937 = vmatprep.subr.bf16.mxu1 %v1194_v0 }
 0x262   :  { %938 = vmatpush3.bf16.msra.mxu1 %v1013_v46 }
 0x263   :  { %969 = vmatprep.subr.bf16.mxu1 %v1194_v0 }
 0x318   :  { %v393_v40 = vpop.f32.mrb[4].mxu1 }
 0x319   :  { %v915_v41 = vpop.f32.mrb[5].mxu1 }
 0x31a   :  { %v396_v42 = vpop.f32.mrb[6].mxu1 }
 0x31b   :  { %v400_v43 = vpack.c.bf16 %v396_v42, %v393_v40  ;;  %v916_v44 = vpop.f32.mrb[7].mxu1 }
 0x31d   :  { %918 = vmatpush3.bf16.msra.mxu0 %v400_v43 }
 0x31e   :  { %943 = vmatprep.subr.bf16.mxu0 %v1194_v0 }
 0x320   :  { %920 = vmatmul.mubr.msk.bf16.vlgmr.msra.gmra.mrb[4].mxu0 %vm247_vm1, %v1381_v15 }
 0x321   :  { %945 = vmatprep.mubr.msk.bf16.mxu0 %vm1195_vm0, %v1194_v0 }
 0x3f3   :  { %v442_v48 = vpop.f32.mrb[4].mxu0 }
 0x3f4   :  { %v443_v49 = vadd.f32 %v805_v47, %v442_v48  ;;  %v921_v50 = vpop.f32.mrb[5].mxu0 }
 0x3f5   :  { %v445_v51 = vpop.f32.mrb[6].mxu0 }
 0x3f6   :  { %v446_v52 = vadd.f32 %v805_v47, %v445_v51  ;;  %v922_v53 = vpop.f32.mrb[7].mxu0  ;;  %v449_v54 = vmax.f32 %v443_v49, 0.0 }
 0x3f8   :  { %v450_v55 = vmax.f32 %v446_v52, 0.0 }
 0x3fa   :  { %v451_v56 = vpack.c.bf16 %v450_v55, %v449_v54 }
 0x3fc   :  { %940 = vmatmul.mubr.bf16.vlgmr.msra.gmra.mrb[8].mxu1 %v451_v56 }
 0x3fd   :  { %971 = vmatprep.mubr.msk.bf16.mxu1 %vm1195_vm0, %v1194_v0 }
 0x4cf   :  { %v550_v57 = vpop.f32.mrb[8].mxu1 }
 0x4d0   :  { %v941_v58 = vpop.f32.mrb[9].mxu1 }
 0x4d1   :  { %v553_v59 = vpop.f32.mrb[10].mxu1 }
 0x4d2   :  { %v557_v60 = vpack.c.bf16 %v553_v59, %v550_v57  ;;  %v942_v61 = vpop.f32.mrb[11].mxu1 }
 0x4d4   :  { %944 = vmatpush3.bf16.msra.mxu0 %v557_v60 }
 0x4d5   :  { %949 = vmatprep.subr.bf16.mxu0 %v1194_v0 }
 0x4d7   :  { %946 = vmatmul.mubr.msk.bf16.vlgmr.msra.gmra.mrb[8].mxu0 %vm247_vm1, %v1381_v15 }
 0x4d8   :  { %950 = vmatpush3.bf16.msra.mxu0 %v1014_v62  ;;  %965 = vmatprep.mubr.msk.bf16.mxu0 %vm1195_vm0, %v1194_v0 }
 0x4d9   :  { %951 = vmatprep.subr.bf16.mxu0 %v1194_v0 }
 0x4dc   :  { %952 = vmatpush3.bf16.msra.mxu0 %v1015_v63 }
 0x4dd   :  { %953 = vmatprep.subr.bf16.mxu0 %v1194_v0 }
 0x4e0   :  { %954 = vmatpush3.bf16.msra.mxu0 %v1016_v1 }
 0x4e1   :  { %955 = vmatprep.subr.bf16.mxu0 %v1194_v0 }
 0x4e4   :  { %956 = vmatpush3.bf16.msra.mxu0 %v1017_v2 }
 0x4e5   :  { %957 = vmatprep.subr.bf16.mxu0 %v1194_v0 }
 0x4e8   :  { %958 = vmatpush3.bf16.msra.mxu0 %v1018_v3 }
 0x4e9   :  { %959 = vmatprep.subr.bf16.mxu0 %v1194_v0 }
 0x4ec   :  { %960 = vmatpush3.bf16.msra.mxu0 %v1019_v4 }
 0x4ed   :  { %961 = vmatprep.subr.bf16.mxu0 %v1194_v0 }
 0x4f0   :  { %962 = vmatpush3.bf16.msra.mxu0 %v1020_v5 }
 0x4f1   :  { %963 = vmatprep.subr.bf16.mxu0 %v1194_v0 }
 0x4f4   :  { %964 = vmatpush3.bf16.msra.mxu0 %v1021_v6 }
 0x5aa   :  { %v599_v8 = vpop.f32.mrb[8].mxu0 }
 0x5ab   :  { %v600_v9 = vadd.f32 %v815_v7, %v599_v8  ;;  %v947_v10 = vpop.f32.mrb[9].mxu0 }
 0x5ac   :  { %v602_v11 = vpop.f32.mrb[10].mxu0 }
 0x5ad   :  { %v603_v12 = vadd.f32 %v815_v7, %v602_v11  ;;  %v948_v13 = vpop.f32.mrb[11].mxu0  ;;  %v606_v14 = vmax.f32 %v600_v9, 0.0 }
 0x5af   :  { %v607_v16 = vmax.f32 %v603_v12, 0.0 }
 0x5b1   :  { %v608_v17 = vpack.c.bf16 %v607_v16, %v606_v14 }
 0x5b3   :  { %966 = vmatmul.mubr.bf16.vlgmr.msra.gmra.mrb[12].mxu0 %v608_v17 }
 0x686   :  { %v707_v18 = vpop.f32.mrb[12].mxu0 }
 0x687   :  { %v967_v19 = vpop.f32.mrb[13].mxu0 }
 0x688   :  { %v710_v20 = vpop.f32.mrb[14].mxu0 }
 0x689   :  { %v714_v0 = vpack.c.bf16 %v710_v20, %v707_v18  ;;  %v968_v21 = vpop.f32.mrb[15].mxu0 }
 0x68b   :  { %970 = vmatpush3.bf16.msra.mxu1 %v714_v0 }
 0x68e   :  { %972 = vmatmul.mubr.msk.bf16.vlgmr.msra.gmra.mrb[12].mxu1 %vm247_vm1, %v1381_v15 }
 0x761   :  { %v756_v23 = vpop.f32.mrb[12].mxu1 }
 0x762   :  { %v757_v24 = vadd.f32 %v825_v22, %v756_v23  ;;  %v973_v25 = vpop.f32.mrb[13].mxu1 }
 0x763   :  { %v759_v26 = vpop.f32.mrb[14].mxu1 }
 0x764   :  { %763 = vst [vmem:[#allocation13] sm:$0xff] %v757_v24  ;;  %v760_v27 = vadd.f32 %v825_v22, %v759_v26  ;;  %v974_v28 = vpop.f32.mrb[15].mxu1 }
 0x766   :  { %764 = vst [vmem:[#allocation13 + $0x8] sm:$0xff] %v760_v27 }
 0x767   :  { %1165 = shalt.err (!%p1162_p10)
}
 0x768   :  { %s1166_s4 = scalar_lea.hbm %s1461_s10, 256 }
 0x769   :  { %p1167_p11 = scmp.ne.s32.totalorder %s1461_s10, %s1166_s4  ;;  %p1170_p12 = scmp.lt.u32.totalorder %s1166_s4, %s1461_s10 }
 0x76b   :  { %p1172_p13 = pnand %p1170_p12, %p1167_p11 }
 0x76d   :  { %1175 = shalt.err (!%p1172_p13)
}
 0x76e   :  { %s1197_s22 = smov 128   ;;  %s1198_s15 = smov 8  }
 0x76f   :  { %776 = dma.vmem_to_hbm [thread:$0]  %s771_s29, 256, %s1461_s10, [#allocation4], %s1197_s22, %s1197_s22, %s1198_s15  }
 0x770   :  { %1184 = dma.done.wait [#allocation4], 256  }
 0x771   :  { %1185 = vsyncadd [#allocation4], 4294967040 }
 0x772   :  { %780 = vsyncpa [#allocation3], 1 }
 0x773   :  { %781 = vsyncpa [#allocation6], 1 }
 0x774   :  { %782 = vsyncpa [#allocation9], 1 }
 0x775   :  { %783 = vsyncpa [#allocation12], 1 }
 0x776   :  { %784 = vsyncpa [#allocation4], 1 }

</bundles_post_ra>
